<compile_context>
chip_gen: v7x
topology: tpu7x:2x2x1
jax: 0.10.0
libtpu: 0.0.40
codegen_flags: <defaults>
</compile_context>

<pallas_src>
import jax
import jax.numpy as jnp
import numpy as np
from jax.experimental import pallas as pl
from jax.experimental.pallas import tpu as pltpu


def _single_layer_kernel(x_ref, w_ref, b_ref, o_ref):
    # x_ref: (TB, Dp) VMEM   w_ref: (1, Dp) VMEM (resident)   b_ref: (1, 1) SMEM
    # o_ref: (TB, 1)
    x = x_ref[...]                      # f32 (TB, Dp)
    w = w_ref[...]                      # f32 (1, Dp) -> broadcasts over rows
    # GEMV as broadcast-multiply (VPU) + lane reduction (XLU); no MXU / no w.T.
    logits = jnp.sum(x * w, axis=-1, keepdims=True) + b_ref[0, 0]
    o_ref[...] = jax.nn.sigmoid(logits).astype(o_ref.dtype)


def _round_up(v, m):
    return ((v + m - 1) // m) * m


def single_layer_net(x, weight, bias, *, tile_b=None):
    """Forward pass of SingleLayerNet: sigmoid(x @ weight.T + bias).

    x:      [B, D] float32
    weight: [1, D] float32  (PyTorch Linear weight layout)
    bias:   [1]    float32
    returns [B, 1] float32
    """
    B, D = x.shape
    D_pad = max(128, _round_up(D, 128))          # lane-dense feature rows

    if tile_b is None:
        # VMEM budget: keep the double-buffered x tile under ~8 MiB so depth-2
        # pipelining survives v7x's 64 MiB-per-TC VMEM (fits v5e/v6e trivially).
        budget_bytes = 8 * 1024 * 1024
        rows = budget_bytes // (2 * D_pad * 4)
        rows = max(8, (rows // 8) * 8)
        tile_b = int(min(1024, rows))
        # Don't pad a tiny batch up to a huge tile.
        tile_b = min(tile_b, _round_up(B, 8))
    assert tile_b % 8 == 0

    B_pad = _round_up(B, tile_b)

    # Zero-pad (exact: padded features contribute 0; padded rows are sliced off).
    if B_pad != B or D_pad != D:
        x_p = jnp.zeros((B_pad, D_pad), x.dtype).at[:B, :D].set(x)
    else:
        x_p = x
    if D_pad != D:
        w_p = jnp.zeros((1, D_pad), weight.dtype).at[:, :D].set(weight)
    else:
        w_p = weight
    bias2d = bias.reshape(1, 1).astype(jnp.float32)

    grid = (B_pad // tile_b,)
    out = pl.pallas_call(
        _single_layer_kernel,
        out_shape=jax.ShapeDtypeStruct((B_pad, 1), jnp.float32),
        grid_spec=pltpu.PrefetchScalarGridSpec(
            num_scalar_prefetch=0,
            grid=grid,
            in_specs=[
                pl.BlockSpec((tile_b, D_pad), lambda i: (i, 0)),   # x tile (streamed)
                pl.BlockSpec((1, D_pad), lambda i: (0, 0)),        # weight (resident)
                pl.BlockSpec(memory_space=pltpu.MemorySpace.SMEM), # scalar bias in SMEM
            ],
            out_specs=pl.BlockSpec((tile_b, 1), lambda i: (i, 0)),
        ),
        compiler_params=pltpu.CompilerParams(
            dimension_semantics=("parallel",),
            vmem_limit_bytes=64 * 1024 * 1024,
        ),
    )(x_p, w_p, bias2d)
    return out[:B]


def _xavier_uniform(key, shape):
    # Matches torch.nn.init.xavier_uniform_ (gain=1): U(-a, a),
    # a = sqrt(6 / (fan_in + fan_out)); shape = (out_features, in_features)
    fan_out, fan_in = shape
    a = float(np.sqrt(6.0 / (fan_in + fan_out)))
    return jax.random.uniform(key, shape, jnp.float32, minval=-a, maxval=a)


if __name__ == "__main__":
    key = jax.random.PRNGKey(0)
    k_x, k_w, k_b = jax.random.split(key, 3)

    batch = 8
    input_size = 32

    x = jax.random.normal(k_x, (batch, input_size), dtype=jnp.float32)
    weight = _xavier_uniform(k_w, (1, input_size))
    # PyTorch default Linear bias init: U(-1/sqrt(fan_in), 1/sqrt(fan_in))
    bound = 1.0 / np.sqrt(input_size)
    bias = jax.random.uniform(k_b, (1,), jnp.float32, minval=-bound, maxval=bound)

    out = single_layer_net(x, weight, bias)
    out = jax.block_until_ready(out)

    # Reference check in plain JAX
    ref = jax.nn.sigmoid(x @ weight.T + bias)
    np.testing.assert_allclose(np.asarray(out), np.asarray(ref), rtol=1e-5, atol=1e-6)

    print("KERNEL_OK")
</pallas_src>

<mosaic_0001>
module attributes {stable_mosaic.version = 11 : i64} {
  func.func @_single_layer_kernel(%arg0: i32, %arg1: memref<8x128xf32, #tpu.memory_space<vmem>>, %arg2: memref<1x128xf32, #tpu.memory_space<vmem>>, %arg3: memref<1x1xf32, #tpu.memory_space<smem>>, %arg4: memref<8x1xf32, #tpu.memory_space<vmem>>) attributes {dimension_semantics = [#tpu.dimension_semantics<parallel>], iteration_bounds = array<i64: 1>, scalar_prefetch = 0 : i64, scratch_operands = 0 : i64, tpu.core_type = #tpu.core_type<tc>, window_params = [{transform_indices = @transform_0, window_bounds = array<i64: 8, 128>}, {pipeline_mode = #tpu.pipeline_mode<synchronous>, transform_indices = @transform_1, window_bounds = array<i64: 1, 128>}, {transform_indices = @transform_2, window_bounds = array<i64: 1, 1>}, {transform_indices = @transform_3, window_bounds = array<i64: 8, 1>}]} {
    %c0 = arith.constant 0 : index
    %c0_0 = arith.constant 0 : index
    %0 = vector.load %arg1[%c0, %c0_0] : memref<8x128xf32, #tpu.memory_space<vmem>>, vector<8x128xf32>
    %c0_1 = arith.constant 0 : index
    %c0_2 = arith.constant 0 : index
    %1 = vector.load %arg2[%c0_1, %c0_2] : memref<1x128xf32, #tpu.memory_space<vmem>>, vector<1x128xf32>
    %2 = vector.broadcast %1 : vector<1x128xf32> to vector<8x128xf32>
    %3 = arith.mulf %0, %2 : vector<8x128xf32>
    %cst = arith.constant dense<0.000000e+00> : vector<8xf32>
    %4 = vector.multi_reduction <add>, %3, %cst [1] : vector<8x128xf32> to vector<8xf32>
    %5 = vector.shape_cast %4 : vector<8xf32> to vector<8x1xf32>
    %c0_3 = arith.constant 0 : index
    %c0_4 = arith.constant 0 : index
    %6 = memref.load %arg3[%c0_3, %c0_4] : memref<1x1xf32, #tpu.memory_space<smem>>
    %7 = vector.broadcast %6 : f32 to vector<8x1xf32>
    %8 = arith.addf %5, %7 : vector<8x1xf32>
    %9 = arith.negf %8 : vector<8x1xf32>
    %10 = math.exp %9 : vector<8x1xf32>
    %cst_5 = arith.constant 1.000000e+00 : f32
    %11 = vector.broadcast %cst_5 : f32 to vector<8x1xf32>
    %12 = arith.addf %11, %10 : vector<8x1xf32>
    %13 = arith.divf %11, %12 : vector<8x1xf32>
    %c0_6 = arith.constant 0 : index
    %c0_7 = arith.constant 0 : index
    %14 = vector.load %arg4[%c0_6, %c0_7] : memref<8x1xf32, #tpu.memory_space<vmem>>, vector<8x1xf32>
    tpu.vector_store %arg4[%c0_6, %c0_7], %13 {strides = array<i32>} : memref<8x1xf32, #tpu.memory_space<vmem>>, vector<8x1xf32>,
    return
  }
  func.func @transform_0(%arg0: i32) -> (i32, i32) {
    %c0_i32 = arith.constant 0 : i32
    %c0_i32_0 = arith.constant 0 : i32
    return %arg0, %c0_i32 : i32, i32
  }
  func.func @transform_1(%arg0: i32) -> (i32, i32) {
    %c0_i32 = arith.constant 0 : i32
    %c0_i32_0 = arith.constant 0 : i32
    %c0_i32_1 = arith.constant 0 : i32
    return %c0_i32, %c0_i32_0 : i32, i32
  }
  func.func @transform_2(%arg0: i32) -> (i32, i32) {
    %c0_i32 = arith.constant 0 : i32
    %c0_i32_0 = arith.constant 0 : i32
    %c0_i32_1 = arith.constant 0 : i32
    return %c0_i32, %c0_i32_0 : i32, i32
  }
  func.func @transform_3(%arg0: i32) -> (i32, i32) {
    %c0_i32 = arith.constant 0 : i32
    %c0_i32_0 = arith.constant 0 : i32
    return %arg0, %c0_i32 : i32, i32
  }
}

</mosaic_0001>

<bundles_post_ra>
// kernel: tpu_custom_call.1
= control target key start
LH: loop header
LB: loop body
LE: loop exit
PB: predicated region body
PF: predicated region fallthrough
CT: control target
= control target key end

     0   :  { %9 = vsyncpa [#allocation4], 0  ;;  %s221_s0 = inlined_call_operand.hbm [shape: f32[8,128], index: 0, kind: input, shape index: {}]   ;;  %s222_s1 = inlined_call_operand.hbm [shape: f32[1,128], index: 1, kind: input, shape index: {}]   ;;  %s223_s2 = inlined_call_operand.<no memory space> [shape: f32[1,1], index: 2, kind: input, shape index: {}]   ;;  %s224_s3 = inlined_call_operand.hbm [shape: f32[8,1], index: 3, kind: output, shape index: {}]  }
   0x1   :  { %10 = vsyncpa [#allocation7], 0 }
   0x2   :  { %11 = vsyncpa [#allocation5], 0  ;;  %s159_s12 = smov [#allocation3]   ;;  %s160_s14 = smov [#allocation6]  }
   0x3   :  { %s18_s13 = sshll.u32 %s159_s12, 4  ;;  %s28_s15 = sshll.u32 %s160_s14, 4  ;;  %s19_s13 = int_to_ptr.vmem [resolvable:$true] %s18_s13  ;;  %s29_s15 = int_to_ptr.vmem [resolvable:$true] %s28_s15 }
   0x4   :  { %s87_s18 = scalar_lea.hbm %s221_s0, 128 }
   0x5   :  { %p88_p0 = scmp.ne.s32.totalorder %s221_s0, %s87_s18  ;;  %p91_p1 = scmp.lt.u32.totalorder %s87_s18, %s221_s0 }
   0x7   :  { %p93_p2 = pnand %p91_p1, %p88_p0 }
   0x9   :  { %96 = shalt.err (!%p93_p2)
}
   0xa   :  { %s97_s23 = scalar_lea.vmem %s19_s13, 128  ;;  %p102_p4 = scmp.lt.s32.totalorder %s19_s13, %s19_s13 }
   0xb   :  { %p98_p3 = scmp.ne.s32.totalorder %s19_s13, %s97_s23  ;;  %p103_p5 = scmp.lt.s32.totalorder %s97_s23, %s97_s23 }
   0xd   :  { %p104_p6 = por %p103_p5, %p102_p4 }
   0xf   :  { %p105_p7 = pnand %p104_p6, %p98_p3 }
  0x11   :  { %108 = shalt.err (!%p105_p7)
}
  0x12   :  { %21 = dma.hbm_to_vmem [thread:$0]  %s221_s0, 128, %s19_s13, [#allocation4]  }
  0x13   :  { %s109_s28 = scalar_lea.hbm %s222_s1, 16 }
  0x14   :  { %p110_p8 = scmp.ne.s32.totalorder %s222_s1, %s109_s28  ;;  %p113_p9 = scmp.lt.u32.totalorder %s109_s28, %s222_s1 }
  0x16   :  { %p115_p10 = pnand %p113_p9, %p110_p8 }
  0x18   :  { %118 = shalt.err (!%p115_p10)
}
  0x19   :  { %s119_s6 = scalar_lea.vmem %s29_s15, 16  ;;  %s123_s7 = scalar_lea.vmem %s29_s15, 32 }
  0x1a   :  { %p120_p11 = scmp.ne.s32.totalorder %s29_s15, %s119_s6  ;;  %p124_p12 = scmp.lt.s32.totalorder %s29_s15, %s29_s15 }
  0x1b   :  { %p125_p13 = scmp.lt.s32.totalorder %s123_s7, %s119_s6 }
  0x1d   :  { %p126_p0 = por %p125_p13, %p124_p12 }
  0x1f   :  { %p127_p1 = pnand %p126_p0, %p120_p11 }
  0x21   :  { %130 = shalt.err (!%p127_p1)
}
  0x22   :  { %31 = dma.hbm_to_vmem [thread:$0]  %s222_s1, 16, %s29_s15, [#allocation7]  }
  0x23   :  { %153 = dma.done.wait [#allocation4], 128  }
  0x24   :  { %154 = vsyncadd [#allocation4], 4294967168 }
  0x25   :  { %155 = dma.done.wait [#allocation7], 16  }
  0x26   :  { %156 = vsyncadd [#allocation7], 4294967280  ;;  %v40_v0 = vld [vmem:[#allocation3] sm:$0xff]  ;;  %v78_v1 = vld [vmem:[#allocation6] ss:$0 sm:$0xff]  ;;  %v52_v3 = vstv %s223_s2  ;;  %s161_s1 = smov [#allocation8]  }
  0x27   :  { %v48_v2 = vmul.f32 %v78_v1, %v40_v0  ;;  %s68_s11 = sshll.u32 %s161_s1, 4  ;;  %vm60_vm0 = vcmask 7168   ;;  %s69_s11 = int_to_ptr.vmem [resolvable:$true] %s68_s11 }
  0x28   :  { %s131_s12 = scalar_lea.vmem %s69_s11, 128  ;;  %p136_p3 = scmp.lt.s32.totalorder %s69_s11, %s69_s11 }
  0x29   :  { %49 = vadd.xlane.f32.xlu0 %v48_v2  ;;  %p132_p2 = scmp.ne.s32.totalorder %s69_s11, %s131_s12  ;;  %p137_p4 = scmp.lt.s32.totalorder %s131_s12, %s131_s12 }
  0x2b   :  { %p138_p5 = por %p137_p4, %p136_p3 }
  0x2d   :  { %p139_p6 = pnand %p138_p5, %p132_p2 }
  0xb6   :  { %v50_v4 = vpop.xlane.xlu0 %49 }
  0xb7   :  { %v53_v5 = vadd.f32 %v52_v3, %v50_v4 }
  0xb9   :  { %v79_v6 = vmul.f32 -1.442695, %v53_v5 }
  0xbb   :  { %83 = vpow2.f32 %v79_v6 }
  0xc5   :  { %v84_v7 = vpop.eup %83 }
  0xc6   :  { %v57_v8 = vadd.f32 1.0, %v84_v7 }
  0xc8   :  { %85 = vrcp.f32 %v57_v8 }
  0xd2   :  { %v86_v9 = vpop.eup %85 }
  0xd3   :  { %61 = vst.msk [vmem:[#allocation8] sm:$0xff] %vm60_vm0, %v86_v9 }
  0xd4   :  { %142 = shalt.err (!%p139_p6)
}
  0xd5   :  { %s143_s14 = scalar_lea.hbm %s224_s3, 128 }
  0xd6   :  { %p144_p7 = scmp.ne.s32.totalorder %s224_s3, %s143_s14  ;;  %p147_p8 = scmp.lt.u32.totalorder %s143_s14, %s224_s3 }
  0xd8   :  { %p149_p9 = pnand %p147_p8, %p144_p7 }
  0xda   :  { %152 = shalt.err (!%p149_p9)
}
  0xdb   :  { %71 = dma.vmem_to_hbm [thread:$0]  %s69_s11, 128, %s224_s3, [#allocation5]  }
  0xdc   :  { %157 = dma.done.wait [#allocation5], 128  }
  0xdd   :  { %158 = vsyncadd [#allocation5], 4294967168 }
  0xde   :  { %75 = vsyncpa [#allocation4], 1 }
  0xdf   :  { %76 = vsyncpa [#allocation7], 1 }
  0xe0   :  { %77 = vsyncpa [#allocation5], 1 }

</bundles_post_ra>
